<compile_context>
chip_gen: v7x
topology: tpu7x:2x2x1
jax: 0.10.0
libtpu: 0.0.40
codegen_flags: <defaults>
</compile_context>

<pallas_src>
import functools
import math

import jax
import jax.numpy as jnp
from jax.experimental import pallas as pl
from jax.experimental.pallas import tpu as pltpu


def _mlm_head_kernel(x_ref, w1_ref, b1_ref, g_ref, beta_ref, wd_ref, bd_ref,
                     o_ref, t_ref, *, eps, inv_h):
    # x_ref:    (TR, H)   sequence_output row tile
    # w1_ref:   (H, H)    transform dense weight, pre-transposed (in, out)
    # b1_ref:   (1, H)    transform dense bias
    # g_ref:    (1, H)    LayerNorm gamma
    # beta_ref: (1, H)    LayerNorm beta
    # wd_ref:   (H, TV)   decoder weight tile, pre-transposed (in, out)
    # bd_ref:   (1, TV)   decoder bias tile
    # o_ref:    (TR, TV)  prediction-scores tile
    # t_ref:    (TR, H)   VMEM scratch: transformed activations (cached per row tile)
    j = pl.program_id(1)

    @pl.when(j == 0)
    def _():
        # Dense: native-dtype operands into the MXU, f32 accumulate.
        x = x_ref[...]
        y = jnp.dot(x, w1_ref[...], preferred_element_type=jnp.float32)
        y = y + b1_ref[...].astype(jnp.float32)

        # GELU (tanh approximation, maps to VPU/EUP).
        # TODO(synk): exact erf-based GELU if config.hidden_act == "gelu" (erf form);
        # the tanh approximation matches "gelu_new"/"gelu_pytorch_tanh".
        y = jax.nn.gelu(y, approximate=True)

        # LayerNorm over hidden axis: single pass, fused sum / sum-of-squares.
        s1 = jnp.sum(y, axis=-1, keepdims=True)
        s2 = jnp.sum(y * y, axis=-1, keepdims=True)
        mean = s1 * inv_h
        var = s2 * inv_h - mean * mean
        norm = (y - mean) * jax.lax.rsqrt(var + eps)
        t = norm * g_ref[...].astype(jnp.float32) + beta_ref[...].astype(jnp.float32)
        t_ref[...] = t.astype(t_ref.dtype)

    # Decoder projection for this vocab tile (native dtype into MXU, f32 acc).
    scores = jnp.dot(t_ref[...], wd_ref[...], preferred_element_type=jnp.float32)
    scores = scores + bd_ref[...].astype(jnp.float32)
    o_ref[...] = scores.astype(o_ref.dtype)


def cosformer_mlm_head(sequence_output, w1, b1, gamma, beta, w_dec, b_dec,
                       *, eps=1e-12, block_rows=256, block_cols=512):
    """CosformerOnlyMLMHead forward.

    sequence_output: (B, S, H)
    w1:    (H, H)  transform dense weight, pre-transposed to (in, out)
    b1:    (H,)    transform dense bias
    gamma: (H,)    LayerNorm weight
    beta:  (H,)    LayerNorm bias
    w_dec: (H, V)  decoder weight, pre-transposed to (in, out)
    b_dec: (V,)    decoder bias
    returns (B, S, V)
    """
    B, S, H = sequence_output.shape
    V = w_dec.shape[1]
    rows = B * S
    dtype = sequence_output.dtype
    itemsize = jnp.dtype(dtype).itemsize

    # ---- row tiling (pad rows to a multiple of the tile if needed) ----
    if rows > block_rows:
        TR = block_rows
        rows_p = -(-rows // TR) * TR
    else:
        TR = rows            # block == full array dim, no (8,128) issue
        rows_p = rows

    # ---- vocab tiling (lane-dense: TV is full V or a multiple of 128) ----
    if V > block_cols:
        TV = block_cols
        V_p = -(-V // TV) * TV
    else:
        TV = V
        V_p = V

    x2 = sequence_output.reshape(rows, H)
    if rows_p != rows:
        x2 = jnp.pad(x2, ((0, rows_p - rows), (0, 0)))

    wd = w_dec
    bd = b_dec
    if V_p != V:
        wd = jnp.pad(wd, ((0, 0), (0, V_p - V)))
        bd = jnp.pad(bd, ((0, V_p - V),))

    b1_2 = b1.reshape(1, H)
    g2 = gamma.reshape(1, H)
    beta2 = beta.reshape(1, H)
    bd2 = bd.reshape(1, V_p)

    grid = (rows_p // TR, V_p // TV)

    # ---- VMEM budget (double-buffered pipelined blocks + scratch) ----
    vmem_est = (
        2 * TR * H * itemsize                                   # x tiles
        + 2 * H * H * jnp.dtype(w1.dtype).itemsize              # transform weight
        + 2 * 3 * H * 4                                         # b1 / gamma / beta
        + 2 * (H * TV + TV) * jnp.dtype(wd.dtype).itemsize      # decoder tiles
        + 2 * TR * TV * itemsize                                # output tiles
        + TR * H * itemsize                                     # scratch
    )
    vmem_limit = int(min(max(2 * vmem_est, 32 * 1024 * 1024), 100 * 1024 * 1024))

    cost = pl.CostEstimate(
        flops=2 * rows_p * H * H + 2 * rows_p * H * V_p,
        transcendentals=rows_p * H,  # tanh in gelu
        bytes_accessed=(rows_p * H + H * H + 3 * H + H * V_p + V_p
                        + rows_p * V_p) * itemsize,
    )

    out = pl.pallas_call(
        functools.partial(_mlm_head_kernel, eps=eps, inv_h=1.0 / H),
        out_shape=jax.ShapeDtypeStruct((rows_p, V_p), dtype),
        grid_spec=pltpu.PrefetchScalarGridSpec(
            num_scalar_prefetch=0,
            grid=grid,
            in_specs=[
                pl.BlockSpec((TR, H), lambda i, j: (i, 0)),   # sequence_output
                pl.BlockSpec((H, H), lambda i, j: (0, 0)),    # transform weight (constant)
                pl.BlockSpec((1, H), lambda i, j: (0, 0)),    # transform bias (constant)
                pl.BlockSpec((1, H), lambda i, j: (0, 0)),    # LN gamma (constant)
                pl.BlockSpec((1, H), lambda i, j: (0, 0)),    # LN beta (constant)
                pl.BlockSpec((H, TV), lambda i, j: (0, j)),   # decoder weight tile
                pl.BlockSpec((1, TV), lambda i, j: (0, j)),   # decoder bias tile
            ],
            out_specs=pl.BlockSpec((TR, TV), lambda i, j: (i, j)),
            scratch_shapes=[pltpu.VMEM((TR, H), dtype)],
        ),
        compiler_params=pltpu.CompilerParams(
            dimension_semantics=("parallel", "arbitrary"),
            vmem_limit_bytes=vmem_limit,
        ),
        cost_estimate=cost,
    )(x2, w1, b1_2, g2, beta2, wd, bd2)

    return out[:rows, :V].reshape(B, S, V)


def _reference(sequence_output, w1, b1, gamma, beta, w_dec, b_dec, eps):
    y = jnp.einsum("bsh,ho->bso", sequence_output, w1) + b1
    y = jax.nn.gelu(y, approximate=True)
    mean = jnp.mean(y, axis=-1, keepdims=True)
    var = jnp.mean((y - mean) ** 2, axis=-1, keepdims=True)
    t = (y - mean) * jax.lax.rsqrt(var + eps) * gamma + beta
    return jnp.einsum("bsh,hv->bsv", t, w_dec) + b_dec


if __name__ == "__main__":
    B, S, H, V = 2, 8, 32, 64
    eps = 1e-12

    key = jax.random.PRNGKey(0)
    k1, k2, k3, k4, k5 = jax.random.split(key, 5)

    sequence_output = jax.random.normal(k1, (B, S, H), dtype=jnp.float32)

    # Linear weights stored pre-transposed as (in, out) = W^T.
    w1 = jax.random.normal(k2, (H, H), dtype=jnp.float32) * (1.0 / math.sqrt(H))
    b1 = jax.random.normal(k3, (H,), dtype=jnp.float32) * 0.02
    gamma = jnp.ones((H,), dtype=jnp.float32)
    beta = jnp.zeros((H,), dtype=jnp.float32)
    w_dec = jax.random.normal(k4, (H, V), dtype=jnp.float32) * (1.0 / math.sqrt(H))
    b_dec = jax.random.normal(k5, (V,), dtype=jnp.float32) * 0.02

    out = cosformer_mlm_head(sequence_output, w1, b1, gamma, beta, w_dec, b_dec,
                             eps=eps)
    out = jax.block_until_ready(out)

    ref = _reference(sequence_output, w1, b1, gamma, beta, w_dec, b_dec, eps)
    assert out.shape == (B, S, V)
    assert jnp.allclose(out, ref, atol=1e-4, rtol=1e-4), "mismatch vs reference"

    print("KERNEL_OK")
</pallas_src>

<mosaic_0001>
module attributes {stable_mosaic.version = 11 : i64} {
  func.func @_mlm_head_kernel(%arg0: i32, %arg1: i32, %arg2: memref<16x32xf32, #tpu.memory_space<vmem>>, %arg3: memref<32x32xf32, #tpu.memory_space<vmem>>, %arg4: memref<1x32xf32, #tpu.memory_space<vmem>>, %arg5: memref<1x32xf32, #tpu.memory_space<vmem>>, %arg6: memref<1x32xf32, #tpu.memory_space<vmem>>, %arg7: memref<32x64xf32, #tpu.memory_space<vmem>>, %arg8: memref<1x64xf32, #tpu.memory_space<vmem>>, %arg9: memref<16x64xf32, #tpu.memory_space<vmem>>, %arg10: memref<16x32xf32, #tpu.memory_space<vmem>>) attributes {dimension_semantics = [#tpu.dimension_semantics<parallel>, #tpu.dimension_semantics<arbitrary>], iteration_bounds = array<i64: 1, 1>, scalar_prefetch = 0 : i64, scratch_operands = 1 : i64, tpu.core_type = #tpu.core_type<tc>, window_params = [{transform_indices = @transform_0, window_bounds = array<i64: 16, 32>}, {pipeline_mode = #tpu.pipeline_mode<synchronous>, transform_indices = @transform_1, window_bounds = array<i64: 32, 32>}, {pipeline_mode = #tpu.pipeline_mode<synchronous>, transform_indices = @transform_2, window_bounds = array<i64: 1, 32>}, {pipeline_mode = #tpu.pipeline_mode<synchronous>, transform_indices = @transform_3, window_bounds = array<i64: 1, 32>}, {pipeline_mode = #tpu.pipeline_mode<synchronous>, transform_indices = @transform_4, window_bounds = array<i64: 1, 32>}, {transform_indices = @transform_5, window_bounds = array<i64: 32, 64>}, {transform_indices = @transform_6, window_bounds = array<i64: 1, 64>}, {transform_indices = @transform_7, window_bounds = array<i64: 16, 64>}]} {
    %c0_i32 = arith.constant 0 : i32
    %0 = arith.cmpi eq, %arg1, %c0_i32 : i32
    %1 = arith.extui %0 : i1 to i32
    %c0_i32_0 = arith.constant 0 : i32
    %2 = arith.cmpi ne, %1, %c0_i32_0 : i32
    scf.if %2 {
      %c0_8 = arith.constant 0 : index
      %c0_9 = arith.constant 0 : index
      %10 = vector.load %arg2[%c0_8, %c0_9] : memref<16x32xf32, #tpu.memory_space<vmem>>, vector<16x32xf32>
      %c0_10 = arith.constant 0 : index
      %c0_11 = arith.constant 0 : index
      %11 = vector.load %arg3[%c0_10, %c0_11] : memref<32x32xf32, #tpu.memory_space<vmem>>, vector<32x32xf32>
      %cst_12 = arith.constant dense<0.000000e+00> : vector<16x32xf32>
      %12 = tpu.matmul %10, %11, %cst_12 {dimension_numbers = #tpu.dot_dimension_numbers<[1], [0], [0], [1], [0, 0, 1, 1], [], []>} : vector<16x32xf32>, vector<32x32xf32>, vector<16x32xf32> -> vector<16x32xf32>
      %c0_13 = arith.constant 0 : index
      %c0_14 = arith.constant 0 : index
      %13 = vector.load %arg4[%c0_13, %c0_14] : memref<1x32xf32, #tpu.memory_space<vmem>>, vector<1x32xf32>
      %14 = vector.broadcast %13 : vector<1x32xf32> to vector<16x32xf32>
      %15 = arith.addf %12, %14 : vector<16x32xf32>
      %16 = arith.mulf %15, %15 : vector<16x32xf32>
      %17 = arith.mulf %15, %16 : vector<16x32xf32>
      %cst_15 = arith.constant 4.471500e-02 : f32
      %18 = vector.broadcast %cst_15 : f32 to vector<16x32xf32>
      %19 = arith.mulf %18, %17 : vector<16x32xf32>
      %20 = arith.addf %15, %19 : vector<16x32xf32>
      %cst_16 = arith.constant 0.797884583 : f32
      %21 = vector.broadcast %cst_16 : f32 to vector<16x32xf32>
      %22 = arith.mulf %21, %20 : vector<16x32xf32>
      %23 = math.tanh %22 : vector<16x32xf32>
      %cst_17 = arith.constant 1.000000e+00 : f32
      %24 = vector.broadcast %cst_17 : f32 to vector<16x32xf32>
      %25 = arith.addf %24, %23 : vector<16x32xf32>
      %cst_18 = arith.constant 5.000000e-01 : f32
      %26 = vector.broadcast %cst_18 : f32 to vector<16x32xf32>
      %27 = arith.mulf %26, %25 : vector<16x32xf32>
      %28 = arith.mulf %15, %27 : vector<16x32xf32>
      %cst_19 = arith.constant dense<0.000000e+00> : vector<16xf32>
      %29 = vector.multi_reduction <add>, %28, %cst_19 [1] : vector<16x32xf32> to vector<16xf32>
      %30 = vector.shape_cast %29 : vector<16xf32> to vector<16x1xf32>
      %31 = arith.mulf %28, %28 : vector<16x32xf32>
      %cst_20 = arith.constant dense<0.000000e+00> : vector<16xf32>
      %32 = vector.multi_reduction <add>, %31, %cst_20 [1] : vector<16x32xf32> to vector<16xf32>
      %33 = vector.shape_cast %32 : vector<16xf32> to vector<16x1xf32>
      %cst_21 = arith.constant 3.125000e-02 : f32
      %34 = vector.broadcast %cst_21 : f32 to vector<16x1xf32>
      %35 = arith.mulf %30, %34 : vector<16x1xf32>
      %cst_22 = arith.constant 3.125000e-02 : f32
      %36 = vector.broadcast %cst_22 : f32 to vector<16x1xf32>
      %37 = arith.mulf %33, %36 : vector<16x1xf32>
      %38 = arith.mulf %35, %35 : vector<16x1xf32>
      %39 = arith.subf %37, %38 : vector<16x1xf32>
      %40 = vector.broadcast %35 : vector<16x1xf32> to vector<16x32xf32>
      %41 = arith.subf %28, %40 : vector<16x32xf32>
      %cst_23 = arith.constant 9.99999996E-13 : f32
      %42 = vector.broadcast %cst_23 : f32 to vector<16x1xf32>
      %43 = arith.addf %39, %42 : vector<16x1xf32>
      %44 = math.rsqrt %43 : vector<16x1xf32>
      %45 = vector.broadcast %44 : vector<16x1xf32> to vector<16x32xf32>
      %46 = arith.mulf %41, %45 : vector<16x32xf32>
      %c0_24 = arith.constant 0 : index
      %c0_25 = arith.constant 0 : index
      %47 = vector.load %arg5[%c0_24, %c0_25] : memref<1x32xf32, #tpu.memory_space<vmem>>, vector<1x32xf32>
      %48 = vector.broadcast %47 : vector<1x32xf32> to vector<16x32xf32>
      %49 = arith.mulf %46, %48 : vector<16x32xf32>
      %c0_26 = arith.constant 0 : index
      %c0_27 = arith.constant 0 : index
      %50 = vector.load %arg6[%c0_26, %c0_27] : memref<1x32xf32, #tpu.memory_space<vmem>>, vector<1x32xf32>
      %51 = vector.broadcast %50 : vector<1x32xf32> to vector<16x32xf32>
      %52 = arith.addf %49, %51 : vector<16x32xf32>
      %c0_28 = arith.constant 0 : index
      %c0_29 = arith.constant 0 : index
      %53 = vector.load %arg10[%c0_28, %c0_29] : memref<16x32xf32, #tpu.memory_space<vmem>>, vector<16x32xf32>
      tpu.vector_store %arg10[%c0_28, %c0_29], %52 {strides = array<i32>} : memref<16x32xf32, #tpu.memory_space<vmem>>, vector<16x32xf32>,
    } else {
    }
    %c0 = arith.constant 0 : index
    %c0_1 = arith.constant 0 : index
    %3 = vector.load %arg10[%c0, %c0_1] : memref<16x32xf32, #tpu.memory_space<vmem>>, vector<16x32xf32>
    %c0_2 = arith.constant 0 : index
    %c0_3 = arith.constant 0 : index
    %4 = vector.load %arg7[%c0_2, %c0_3] : memref<32x64xf32, #tpu.memory_space<vmem>>, vector<32x64xf32>
    %cst = arith.constant dense<0.000000e+00> : vector<16x64xf32>
    %5 = tpu.matmul %3, %4, %cst {dimension_numbers = #tpu.dot_dimension_numbers<[1], [0], [0], [1], [0, 0, 1, 1], [], []>} : vector<16x32xf32>, vector<32x64xf32>, vector<16x64xf32> -> vector<16x64xf32>
    %c0_4 = arith.constant 0 : index
    %c0_5 = arith.constant 0 : index
    %6 = vector.load %arg8[%c0_4, %c0_5] : memref<1x64xf32, #tpu.memory_space<vmem>>, vector<1x64xf32>
    %7 = vector.broadcast %6 : vector<1x64xf32> to vector<16x64xf32>
    %8 = arith.addf %5, %7 : vector<16x64xf32>
    %c0_6 = arith.constant 0 : index
    %c0_7 = arith.constant 0 : index
    %9 = vector.load %arg9[%c0_6, %c0_7] : memref<16x64xf32, #tpu.memory_space<vmem>>, vector<16x64xf32>
    tpu.vector_store %arg9[%c0_6, %c0_7], %8 {strides = array<i32>} : memref<16x64xf32, #tpu.memory_space<vmem>>, vector<16x64xf32>,
    return
  }
  func.func @transform_0(%arg0: i32, %arg1: i32) -> (i32, i32) {
    %c0_i32 = arith.constant 0 : i32
    %c0_i32_0 = arith.constant 0 : i32
    return %arg0, %c0_i32 : i32, i32
  }
  func.func @transform_1(%arg0: i32, %arg1: i32) -> (i32, i32) {
    %c0_i32 = arith.constant 0 : i32
    %c0_i32_0 = arith.constant 0 : i32
    %c0_i32_1 = arith.constant 0 : i32
    return %c0_i32, %c0_i32_0 : i32, i32
  }
  func.func @transform_2(%arg0: i32, %arg1: i32) -> (i32, i32) {
    %c0_i32 = arith.constant 0 : i32
    %c0_i32_0 = arith.constant 0 : i32
    %c0_i32_1 = arith.constant 0 : i32
    return %c0_i32, %c0_i32_0 : i32, i32
  }
  func.func @transform_3(%arg0: i32, %arg1: i32) -> (i32, i32) {
    %c0_i32 = arith.constant 0 : i32
    %c0_i32_0 = arith.constant 0 : i32
    %c0_i32_1 = arith.constant 0 : i32
    return %c0_i32, %c0_i32_0 : i32, i32
  }
  func.func @transform_4(%arg0: i32, %arg1: i32) -> (i32, i32) {
    %c0_i32 = arith.constant 0 : i32
    %c0_i32_0 = arith.constant 0 : i32
    %c0_i32_1 = arith.constant 0 : i32
    return %c0_i32, %c0_i32_0 : i32, i32
  }
  func.func @transform_5(%arg0: i32, %arg1: i32) -> (i32, i32) {
    %c0_i32 = arith.constant 0 : i32
    %c0_i32_0 = arith.constant 0 : i32
    return %c0_i32, %arg1 : i32, i32
  }
  func.func @transform_6(%arg0: i32, %arg1: i32) -> (i32, i32) {
    %c0_i32 = arith.constant 0 : i32
    %c0_i32_0 = arith.constant 0 : i32
    return %c0_i32, %arg1 : i32, i32
  }
  func.func @transform_7(%arg0: i32, %arg1: i32) -> (i32, i32) {
    %c0_i32 = arith.constant 0 : i32
    return %arg0, %arg1 : i32, i32
  }
}

</mosaic_0001>

<bundles_post_ra>
// kernel: tpu_custom_call.1
= control target key start
LH: loop header
LB: loop body
LE: loop exit
PB: predicated region body
PF: predicated region fallthrough
CT: control target
= control target key end

     0   :  { %12 = vsyncpa [#allocation4], 0  ;;  %s652_s0 = inlined_call_operand.hbm [shape: f32[16,32], index: 0, kind: input, shape index: {}]   ;;  %s653_s1 = inlined_call_operand.hbm [shape: f32[32,32], index: 1, kind: input, shape index: {}]   ;;  %s654_s2 = inlined_call_operand.vmem [shape: f32[1,32], index: 2, kind: input, shape index: {}]   ;;  %s655_s3 = inlined_call_operand.vmem [shape: f32[1,32], index: 3, kind: input, shape index: {}]   ;;  %s656_s4 = inlined_call_operand.vmem [shape: f32[1,32], index: 4, kind: input, shape index: {}]   ;;  %s657_s5 = inlined_call_operand.hbm [shape: f32[32,64], index: 5, kind: input, shape index: {}]   ;;  %s658_s6 = inlined_call_operand.vmem [shape: f32[1,64], index: 6, kind: input, shape index: {}]   ;;  %s659_s7 = inlined_call_operand.hbm [shape: f32[16,64], index: 7, kind: output, shape index: {}]  }
   0x1   :  { %13 = vsyncpa [#allocation7], 0 }
   0x2   :  { %14 = vsyncpa [#allocation5], 0  ;;  %s517_s24 = smov [#allocation6]   ;;  %s518_s26 = smov [#allocation3]  }
   0x3   :  { %s32_s25 = sshll.u32 %s517_s24, 4  ;;  %s20_s27 = sshll.u32 %s518_s26, 4  ;;  %s33_s25 = int_to_ptr.vmem [resolvable:$true] %s32_s25  ;;  %s563_s27 = int_to_ptr.vmem [resolvable:$true] %s20_s27 }
   0x4   :  { %s423_s30 = scalar_lea.hbm %s653_s1, 512 }
   0x5   :  { %p424_p0 = scmp.ne.s32.totalorder %s653_s1, %s423_s30  ;;  %p427_p1 = scmp.lt.u32.totalorder %s423_s30, %s653_s1 }
   0x7   :  { %p429_p2 = pnand %p427_p1, %p424_p0 }
   0x9   :  { %432 = shalt.err (!%p429_p2)
}
   0xa   :  { %s433_s12 = scalar_lea.vmem %s33_s25, 512  ;;  %p438_p4 = scmp.lt.s32.totalorder %s33_s25, %s33_s25 }
   0xb   :  { %p434_p3 = scmp.ne.s32.totalorder %s33_s25, %s433_s12  ;;  %p439_p5 = scmp.lt.s32.totalorder %s433_s12, %s433_s12 }
   0xd   :  { %p440_p6 = por %p439_p5, %p438_p4 }
   0xf   :  { %p441_p7 = pnand %p440_p6, %p434_p3 }
  0x11   :  { %444 = shalt.err (!%p441_p7)
}
  0x12   :  { %s519_s13 = smov 128   ;;  %s520_s14 = smov 8  }
  0x13   :  { %38 = dma.hbm_to_vmem [thread:$0]  %s653_s1, 512, %s33_s25, [#allocation7], %s519_s13, %s519_s13, %s520_s14  }
  0x14   :  { %s445_s19 = scalar_lea.hbm %s652_s0, 256 }
  0x15   :  { %p446_p8 = scmp.ne.s32.totalorder %s652_s0, %s445_s19  ;;  %p449_p9 = scmp.lt.u32.totalorder %s445_s19, %s652_s0 }
  0x17   :  { %p451_p10 = pnand %p449_p9, %p446_p8 }
  0x19   :  { %454 = shalt.err (!%p451_p10)
}
  0x1a   :  { %s455_s24 = scalar_lea.vmem %s563_s27, 256  ;;  %p460_p12 = scmp.lt.s32.totalorder %s563_s27, %s563_s27 }
  0x1b   :  { %p456_p11 = scmp.ne.s32.totalorder %s563_s27, %s455_s24  ;;  %p461_p13 = scmp.lt.s32.totalorder %s455_s24, %s455_s24 }
  0x1d   :  { %p462_p0 = por %p461_p13, %p460_p12 }
  0x1f   :  { %p463_p1 = pnand %p462_p0, %p456_p11 }
  0x21   :  { %466 = shalt.err (!%p463_p1)
}
  0x22   :  { %26 = dma.hbm_to_vmem [thread:$0]  %s652_s0, 256, %s563_s27, [#allocation4], %s519_s13, %s519_s13, %s520_s14  }
  0x23   :  { %s521_s26 = smov [#allocation8]   ;;  %s467_s8 = scalar_lea.hbm %s657_s5, 512 }
  0x24   :  { %s50_s28 = sshll.u32 %s521_s26, 4  ;;  %p468_p2 = scmp.ne.s32.totalorder %s657_s5, %s467_s8  ;;  %s51_s28 = int_to_ptr.vmem [resolvable:$true] %s50_s28 }
  0x25   :  { %p471_p3 = scmp.lt.u32.totalorder %s467_s8, %s657_s5 }
  0x27   :  { %p473_p4 = pnand %p471_p3, %p468_p2 }
  0x29   :  { %476 = shalt.err (!%p473_p4)
}
  0x2a   :  { %s477_s15 = scalar_lea.vmem %s51_s28, 512  ;;  %p482_p6 = scmp.lt.s32.totalorder %s51_s28, %s51_s28 }
  0x2b   :  { %p478_p5 = scmp.ne.s32.totalorder %s51_s28, %s477_s15  ;;  %p483_p7 = scmp.lt.s32.totalorder %s477_s15, %s477_s15 }
  0x2d   :  { %p484_p8 = por %p483_p7, %p482_p6 }
  0x2f   :  { %p485_p9 = pnand %p484_p8, %p478_p5 }
  0x31   :  { %488 = shalt.err (!%p485_p9)
}
  0x32   :  { %56 = dma.hbm_to_vmem [thread:$0]  %s657_s5, 512, %s51_s28, [#allocation7], %s519_s13, %s519_s13, %s520_s14  }
  0x33   :  { %511 = dma.done.wait [#allocation4], 256  }
  0x34   :  { %512 = vsyncadd [#allocation4], 4294967040 }
  0x35   :  { %513 = dma.done.wait [#allocation7], 1024  }
  0x36   :  { %514 = vsyncadd [#allocation7], 4294966272  ;;  %vm85_vm0 = vcmask 261120   ;;  %v74_v0 = vld [vmem:[#allocation6] sm:$0xff]  ;;  %v75_v1 = vld [vmem:[#allocation6 + $0x8] sm:$0xff]  ;;  %vm330_vm1 = vcmask 523264  }
  0x37   :  { %v76_v2 = vld [vmem:[#allocation6 + $0x10] sm:$0xff]  ;;  %v393_v3 = vpack.c.bf16 %v75_v1, %v74_v0  ;;  %v77_v4 = vld [vmem:[#allocation6 + $0x18] sm:$0xff]  ;;  %v351_v8 = vld [vmem:[%s654_s2] ss:$0 sm:$0xff] }
  0x38   :  { %v72_v5 = vld [vmem:[#allocation3] sm:$0xff]  ;;  %v397_v6 = vpack.c.bf16 %v77_v4, %v76_v2  ;;  %v73_v7 = vld [vmem:[#allocation3 + $0x8] sm:$0xff]  ;;  %v237_v37 = vld [vmem:[#allocation8] sm:$0xff] }
  0x39   :  { %379 = vmatprep.mubr.msk.f32.mxu0 %vm85_vm0, %v72_v5  ;;  %394 = vmatprep.subr.bf16.mxu0 %v393_v3  ;;  %v238_v38 = vld [vmem:[#allocation8 + $0x8] sm:$0xff]  ;;  %v239_v40 = vld [vmem:[#allocation8 + $0x10] sm:$0xff]  ;;  %v240_v41 = vld [vmem:[#allocation8 + $0x18] sm:$0xff] }
  0x3a   :  { %396 = vmatpush3.bf16.msra.mxu0 %v393_v3  ;;  %v401_v39 = vpack.c.bf16 %v238_v38, %v237_v37  ;;  %v405_v42 = vpack.c.bf16 %v240_v41, %v239_v40  ;;  %v354_v59 = vld [vmem:[%s655_s3] ss:$0 sm:$0xff] }
  0x3b   :  { %398 = vmatprep.subr.bf16.mxu0 %v397_v6  ;;  %v355_v61 = vld [vmem:[%s656_s4] ss:$0 sm:$0xff]  ;;  %s522_s4 = smov [#allocation9]  }
  0x3c   :  { %402 = vmatprep.subr.bf16.mxu1 %v401_v39  ;;  %s338_s21 = sshll.u32 %s522_s4, 4  ;;  %s339_s21 = int_to_ptr.vmem [resolvable:$true] %s338_s21 }
  0x3d   :  { %404 = vmatpush3.bf16.msra.mxu1 %v401_v39  ;;  %s489_s22 = scalar_lea.vmem %s339_s21, 256  ;;  %p494_p11 = scmp.lt.s32.totalorder %s339_s21, %s339_s21 }
  0x3e   :  { %400 = vmatpush3.bf16.msra.mxu0 %v397_v6  ;;  %406 = vmatprep.subr.bf16.mxu1 %v405_v42  ;;  %p490_p10 = scmp.ne.s32.totalorder %s339_s21, %s489_s22  ;;  %p495_p12 = scmp.lt.s32.totalorder %s489_s22, %s489_s22 }
  0x40   :  { %p496_p13 = por %p495_p12, %p494_p11 }
  0x41   :  { %380 = vmatmul.mubr.msk.f32.vlgmr.msra.gmra.mrb[0].mxu0 %vm85_vm0, %v73_v7  ;;  %408 = vmatpush3.bf16.msra.mxu1 %v405_v42  ;;  %v356_v7 = vld [vmem:[%s658_s6] ss:$0 sm:$0xff] }
  0x42   :  { %p497_p0 = pnand %p496_p13, %p490_p10 }
 0x114   :  { %v381_v9 = vpop.f32.mrb[0].mxu0 }
 0x115   :  { %v164_v10 = vadd.f32 %v381_v9, %v351_v8  ;;  %v158_v11 = vpop.f32.mrb[1].mxu0 }
 0x116   :  { %v159_v12 = vadd.f32 %v351_v8, %v158_v11 }
 0x117   :  { %v168_v13 = vmul.f32 %v164_v10, %v164_v10 }
 0x118   :  { %v167_v14 = vmul.f32 %v159_v12, %v159_v12 }
 0x119   :  { %v170_v15 = vmul.f32 %v168_v13, %v164_v10 }
 0x11a   :  { %v169_v16 = vmul.f32 %v167_v14, %v159_v12 }
 0x11b   :  { %v172_v17 = vmul.f32 0.044715, %v170_v15 }
 0x11c   :  { %v171_v18 = vmul.f32 0.044715, %v169_v16 }
 0x11d   :  { %v174_v19 = vadd.f32 %v172_v17, %v164_v10 }
 0x11e   :  { %v173_v20 = vadd.f32 %v171_v18, %v159_v12 }
 0x11f   :  { %v176_v21 = vmul.f32 0.7978846, %v174_v19 }
 0x120   :  { %v175_v22 = vmul.f32 0.7978846, %v173_v20 }
 0x121   :  { %415 = vtanh.f32 %v176_v21 }
 0x122   :  { %417 = vtanh.f32 %v175_v22 }
 0x12b   :  { %v416_v23 = vpop.eup %415 }
 0x12c   :  { %v418_v24 = vpop.eup %417  ;;  %v180_v25 = vadd.f32 1.0, %v416_v23 }
 0x12d   :  { %v179_v26 = vadd.f32 1.0, %v418_v24 }
 0x12e   :  { %v182_v27 = vmul.f32 0.5, %v180_v25 }
 0x12f   :  { %v181_v28 = vmul.f32 0.5, %v179_v26 }
 0x130   :  { %v184_v30 = vmul.f32 %v182_v27, %v164_v10 }
 0x131   :  { %v183_v29 = vmul.f32 %v181_v28, %v159_v12 }
 0x132   :  { %v192_v34 = vmul.f32 %v184_v30, %v184_v30  ;;  %v188_v35 = vsel %vm85_vm0, %v184_v30, 0.0 }
 0x133   :  { %v185_v31 = vsel %vm85_vm0, %v183_v29, 0.0  ;;  %v191_v32 = vmul.f32 %v183_v29, %v183_v29 }
 0x134   :  { %186 = vadd.xlane.f32.xlu0 %v185_v31  ;;  %v196_v36 = vsel %vm85_vm0, %v192_v34, 0.0 }
 0x135   :  { %v193_v33 = vsel %vm85_vm0, %v191_v32, 0.0 }
 0x136   :  { %194 = vadd.xlane.f32.xlu1 %v193_v33 }
 0x138   :  { %189 = vadd.xlane.f32.xlu0 %v188_v35 }
 0x13a   :  { %197 = vadd.xlane.f32.xlu1 %v196_v36 }
 0x1c1   :  { %v187_v43 = vpop.xlane.xlu0 %186 }
 0x1c2   :  { %v199_v44 = vmul.f32 0.03125, %v187_v43 }
 0x1c3   :  { %v195_v45 = vpop.xlane.xlu1 %194 }
 0x1c4   :  { %v203_v46 = vmul.f32 %v199_v44, %v199_v44  ;;  %v201_v47 = vmul.f32 0.03125, %v195_v45  ;;  %v207_v57 = vsub.f32 %v183_v29, %v199_v44 }
 0x1c5   :  { %v190_v48 = vpop.xlane.xlu0 %189 }
 0x1c6   :  { %v205_v49 = vsub.f32 %v201_v47, %v203_v46  ;;  %v200_v50 = vmul.f32 0.03125, %v190_v48 }
 0x1c7   :  { %v198_v51 = vpop.xlane.xlu1 %197 }
 0x1c8   :  { %v209_v52 = vadd.f32 1e-12, %v205_v49  ;;  %v204_v53 = vmul.f32 %v200_v50, %v200_v50  ;;  %v202_v54 = vmul.f32 0.03125, %v198_v51  ;;  %v208_v63 = vsub.f32 %v184_v30, %v200_v50 }
 0x1ca   :  { %419 = vrsqrt.f32 %v209_v52  ;;  %v206_v55 = vsub.f32 %v202_v54, %v204_v53 }
 0x1cc   :  { %v210_v56 = vadd.f32 1e-12, %v206_v55 }
 0x1ce   :  { %421 = vrsqrt.f32 %v210_v56 }
 0x1d4   :  { %v420_v58 = vpop.eup %419 }
 0x1d5   :  { %v213_v60 = vmul.f32 %v420_v58, %v207_v57 }
 0x1d7   :  { %v222_v62 = vmul.f32 %v354_v59, %v213_v60 }
 0x1d8   :  { %v422_v0 = vpop.eup %421 }
 0x1d9   :  { %v231_v1 = vadd.f32 %v355_v61, %v222_v62  ;;  %v214_v2 = vmul.f32 %v422_v0, %v208_v63 }
 0x1db   :  { %233 = vst.msk [vmem:[#allocation2] sm:$0xff] %vm85_vm0, %v231_v1  ;;  %v223_v3 = vmul.f32 %v354_v59, %v214_v2 }
 0x1dd   :  { %v232_v4 = vadd.f32 %v355_v61, %v223_v3 }
 0x1df   :  { %234 = vst.msk [vmem:[#allocation2 + $0x8] sm:$0xff] %vm85_vm0, %v232_v4 }
 0x1e2   :  { %v235_v5 = vld [vmem:[#allocation2] sm:$0xff] }
 0x1e3   :  { %390 = vmatprep.mubr.msk.f32.mxu1 %vm85_vm0, %v235_v5 }
 0x1e6   :  { %v236_v6 = vld [vmem:[#allocation2 + $0x8] sm:$0xff] }
 0x1e7   :  { %391 = vmatmul.mubr.msk.f32.vlgmr.msra.gmra.mrb[0].mxu1 %vm85_vm0, %v236_v6 }
 0x2ba   :  { %v392_v8 = vpop.f32.mrb[0].mxu1 }
 0x2bb   :  { %v327_v9 = vadd.f32 %v392_v8, %v356_v7  ;;  %v321_v10 = vpop.f32.mrb[1].mxu1 }
 0x2bc   :  { %v322_v11 = vadd.f32 %v356_v7, %v321_v10 }
 0x2bd   :  { %332 = vst.msk [vmem:[#allocation9 + $0x8] sm:$0xff] %vm330_vm1, %v327_v9 }
 0x2be   :  { %331 = vst.msk [vmem:[#allocation9] sm:$0xff] %vm330_vm1, %v322_v11 }
 0x2bf   :  { %500 = shalt.err (!%p497_p0)
}
 0x2c0   :  { %s501_s6 = scalar_lea.hbm %s659_s7, 256 }
 0x2c1   :  { %p502_p1 = scmp.ne.s32.totalorder %s659_s7, %s501_s6  ;;  %p505_p2 = scmp.lt.u32.totalorder %s501_s6, %s659_s7 }
 0x2c3   :  { %p507_p3 = pnand %p505_p2, %p502_p1 }
 0x2c5   :  { %510 = shalt.err (!%p507_p3)
}
 0x2c6   :  { %344 = dma.vmem_to_hbm [thread:$0]  %s339_s21, 256, %s659_s7, [#allocation5], %s519_s13, %s519_s13, %s520_s14  }
 0x2c7   :  { %515 = dma.done.wait [#allocation5], 256  }
 0x2c8   :  { %516 = vsyncadd [#allocation5], 4294967040 }
 0x2c9   :  { %348 = vsyncpa [#allocation4], 1 }
 0x2ca   :  { %349 = vsyncpa [#allocation7], 1 }
 0x2cb   :  { %350 = vsyncpa [#allocation5], 1 }

</bundles_post_ra>
